<compile_context>
chip_gen: v7x
topology: tpu7x:2x2x1
jax: 0.10.0
libtpu: 0.0.40
codegen_flags: <defaults>
</compile_context>

<pallas_src>
import jax
import jax.numpy as jnp
from jax.experimental import pallas as pl
from jax.experimental.pallas import tpu as pltpu

# ---- static model configuration (small, consistent with the module) ----
B = 2          # batch
S = 8          # sequence length (mean-pooled away)
D = 32         # d_model
C = 10         # n_class
C_PAD = 128    # lane-dense padded class dimension (sliced back to C outside)
B_PAD = 8      # sublane-dense padded batch dimension for the output store
P_ROWS = D + 8  # packed-parameter rows: [0,D) = W/S, row D = bias, rest = 0
NEG_BIG = -1e30  # bias for padded classes: exp(NEG_BIG - max) underflows to 0


def generator_kernel(x_ref, p_ref, o_ref):
    # x_ref: (B*S, D)       flattened activations
    # p_ref: (D+8, C_PAD)   rows [0,D): W * (1/S) (zero past C); row D: bias
    #                       (NEG_BIG past C); rows D+1..: zero padding.
    # o_ref: (B_PAD, C_PAD) log-softmax output; rows >= B and lanes >= C are
    #                       padding and are sliced off by the wrapper.

    w = p_ref[:D, :]                       # (D, C_PAD)   static slice (free)
    bias = p_ref[D:D + 1, :]               # (1, C_PAD)   static slice (free)

    # Single MXU matmul; the 1/S mean factor is already folded into w.
    y = jnp.dot(x_ref[...], w, preferred_element_type=jnp.float32)  # (B*S, C_PAD)

    # Sequence reduction on the sublane axis (XLU): sum_s x[b,s] @ (W/S)
    #   == mean_s(x[b,s]) @ W.
    summed = jnp.sum(y.reshape(B, S, C_PAD), axis=1)                 # (B, C_PAD)

    logits = summed + bias                                           # (B, C_PAD)

    # Numerically-stable log_softmax over the last (lane) dim. Padded columns
    # hold ~-1e30: never the max, exp() -> 0, so real-class results are exact.
    m = jnp.max(logits, axis=-1, keepdims=True)
    z = logits - m
    lse = jnp.log(jnp.sum(jnp.exp(z), axis=-1, keepdims=True))
    lp = z - lse                                                     # (B, C_PAD)

    # Pad rows up to a full 8-sublane tile so the store is an unmasked vst.
    o_ref[...] = jnp.concatenate(
        [lp, jnp.zeros((B_PAD - B, C_PAD), jnp.float32)], axis=0)


def make_generator(w, b, *, seq_len):
    """Build the Generator forward pass.

    w: (D, C) f32 in `y = x @ W + b` layout (transpose of nn.Linear.weight);
    b: (C,)  f32.
    All constant packing/padding is done ONCE here, not per call.
    """
    d_model, n_class = w.shape

    # Packed parameter block: weight pre-scaled by 1/S, bias as an extra row,
    # class dim zero/NEG_BIG-padded to 128 lanes, rows padded to a multiple of 8.
    params = jnp.zeros((P_ROWS, C_PAD), jnp.float32)
    params = params.at[:d_model, :n_class].set(w / float(seq_len))
    params = params.at[d_model, :].set(NEG_BIG)
    params = params.at[d_model, :n_class].set(b)

    @jax.jit
    def forward(x):
        bx, sx, dx = x.shape
        x_flat = x.reshape(bx * sx, dx)   # only per-call prep (free reshape)

        out_pad = pl.pallas_call(
            generator_kernel,
            out_shape=jax.ShapeDtypeStruct((B_PAD, C_PAD), jnp.float32),
            in_specs=[
                pl.BlockSpec(memory_space=pltpu.MemorySpace.VMEM),
                pl.BlockSpec(memory_space=pltpu.MemorySpace.VMEM),
            ],
            out_specs=pl.BlockSpec(memory_space=pltpu.MemorySpace.VMEM),
        )(x_flat, params)

        return out_pad[:bx, :n_class]

    return forward


def _reference(x, w, b):
    """Pure-JAX reference of Generator.forward (sanity check)."""
    xm = x.mean(axis=1)                      # (B, D)
    logits = xm @ w + b                      # (B, C)
    return jax.nn.log_softmax(logits, axis=-1)


if __name__ == "__main__":
    key = jax.random.PRNGKey(0)
    kx, kw, kb = jax.random.split(key, 3)

    x = jax.random.normal(kx, (B, S, D), jnp.float32)
    # nn.Linear(d_model, n_class) stores weight as (C, D); we keep the
    # transposed (D, C) layout so the kernel computes y = x @ W + b (same math).
    w = 0.1 * jax.random.normal(kw, (D, C), jnp.float32)
    b = 0.1 * jax.random.normal(kb, (C,), jnp.float32)

    generator = make_generator(w, b, seq_len=S)   # constants packed once here

    out = jax.block_until_ready(generator(x))

    ref = _reference(x, w, b)
    assert out.shape == (B, C)
    assert jnp.allclose(out, ref, atol=1e-4, rtol=1e-4), "mismatch vs reference"
    print("KERNEL_OK")
</pallas_src>

<mosaic_0001>
module attributes {stable_mosaic.version = 11 : i64} {
  func.func @generator_kernel(%arg0: memref<16x32xf32, #tpu.memory_space<vmem>>, %arg1: memref<40x128xf32, #tpu.memory_space<vmem>>, %arg2: memref<8x128xf32, #tpu.memory_space<vmem>>) attributes {dimension_semantics = [], scalar_prefetch = 0 : i64, scratch_operands = 0 : i64, tpu.core_type = #tpu.core_type<tc>} {
    %c0 = arith.constant 0 : index
    %c0_0 = arith.constant 0 : index
    %0 = vector.load %arg1[%c0, %c0_0] : memref<40x128xf32, #tpu.memory_space<vmem>>, vector<32x128xf32>
    %c32 = arith.constant 32 : index
    %c0_1 = arith.constant 0 : index
    %1 = vector.load %arg1[%c32, %c0_1] : memref<40x128xf32, #tpu.memory_space<vmem>>, vector<1x128xf32>
    %c0_2 = arith.constant 0 : index
    %c0_3 = arith.constant 0 : index
    %2 = vector.load %arg0[%c0_2, %c0_3] : memref<16x32xf32, #tpu.memory_space<vmem>>, vector<16x32xf32>
    %cst = arith.constant dense<0.000000e+00> : vector<16x128xf32>
    %3 = tpu.matmul %2, %0, %cst {dimension_numbers = #tpu.dot_dimension_numbers<[1], [0], [0], [1], [0, 0, 1, 1], [], []>} : vector<16x32xf32>, vector<32x128xf32>, vector<16x128xf32> -> vector<16x128xf32>
    %4 = vector.shape_cast %3 : vector<16x128xf32> to vector<2x8x128xf32>
    %cst_4 = arith.constant dense<0.000000e+00> : vector<2x128xf32>
    %5 = vector.multi_reduction <add>, %4, %cst_4 [1] : vector<2x8x128xf32> to vector<2x128xf32>
    %6 = vector.broadcast %1 : vector<1x128xf32> to vector<2x128xf32>
    %7 = arith.addf %5, %6 : vector<2x128xf32>
    %cst_5 = arith.constant dense<0xFF800000> : vector<2xf32>
    %8 = vector.multi_reduction <maximumf>, %7, %cst_5 [1] : vector<2x128xf32> to vector<2xf32>
    %9 = vector.shape_cast %8 : vector<2xf32> to vector<2x1xf32>
    %10 = vector.broadcast %9 : vector<2x1xf32> to vector<2x128xf32>
    %11 = arith.subf %7, %10 : vector<2x128xf32>
    %12 = math.exp %11 : vector<2x128xf32>
    %cst_6 = arith.constant dense<0.000000e+00> : vector<2xf32>
    %13 = vector.multi_reduction <add>, %12, %cst_6 [1] : vector<2x128xf32> to vector<2xf32>
    %14 = vector.shape_cast %13 : vector<2xf32> to vector<2x1xf32>
    %15 = math.log %14 : vector<2x1xf32>
    %16 = vector.broadcast %15 : vector<2x1xf32> to vector<2x128xf32>
    %17 = arith.subf %11, %16 : vector<2x128xf32>
    %cst_7 = arith.constant 0.000000e+00 : f32
    %18 = vector.broadcast %cst_7 : f32 to vector<6x128xf32>
    %19 = tpu.concatenate %17, %18 in 0 : vector<2x128xf32>, vector<6x128xf32> -> vector<8x128xf32>
    %c0_8 = arith.constant 0 : index
    %c0_9 = arith.constant 0 : index
    %20 = vector.load %arg2[%c0_8, %c0_9] : memref<8x128xf32, #tpu.memory_space<vmem>>, vector<8x128xf32>
    tpu.vector_store %arg2[%c0_8, %c0_9], %19 {strides = array<i32>} : memref<8x128xf32, #tpu.memory_space<vmem>>, vector<8x128xf32>,
    return
  }
}

</mosaic_0001>

<bundles_post_ra>
// kernel: forward.1
= control target key start
LH: loop header
LB: loop body
LE: loop exit
PB: predicated region body
PF: predicated region fallthrough
CT: control target
= control target key end

     0   :  { %7 = vsyncpa [#allocation3], 0  ;;  %s333_s0 = inlined_call_operand.hbm [shape: f32[16,32], index: 0, kind: input, shape index: {}]   ;;  %s334_s1 = inlined_call_operand.hbm [shape: f32[40,128], index: 1, kind: input, shape index: {}]   ;;  %s335_s2 = inlined_call_operand.vmem [shape: f32[8,128], index: 2, kind: output, shape index: {}]  }
   0x1   :  { %8 = vsyncpa [#allocation5], 0  ;;  %s281_s9 = smov [#allocation2]   ;;  %s233_s13 = scalar_lea.hbm %s333_s0, 256 }
   0x2   :  { %s14_s10 = sshll.u32 %s281_s9, 4  ;;  %p234_p0 = scmp.ne.s32.totalorder %s333_s0, %s233_s13  ;;  %s15_s10 = int_to_ptr.vmem [resolvable:$true] %s14_s10 }
   0x3   :  { %p237_p1 = scmp.lt.u32.totalorder %s233_s13, %s333_s0 }
   0x5   :  { %p239_p2 = pnand %p237_p1, %p234_p0 }
   0x7   :  { %242 = shalt.err (!%p239_p2)
}
   0x8   :  { %s243_s18 = scalar_lea.vmem %s15_s10, 256  ;;  %p248_p4 = scmp.lt.s32.totalorder %s15_s10, %s15_s10 }
   0x9   :  { %p244_p3 = scmp.ne.s32.totalorder %s15_s10, %s243_s18  ;;  %p249_p5 = scmp.lt.s32.totalorder %s243_s18, %s243_s18 }
   0xb   :  { %p250_p6 = por %p249_p5, %p248_p4 }
   0xd   :  { %p251_p7 = pnand %p250_p6, %p244_p3 }
   0xf   :  { %254 = shalt.err (!%p251_p7)
}
  0x10   :  { %s282_s19 = smov 128   ;;  %s283_s20 = smov 8  }
  0x11   :  { %20 = dma.hbm_to_vmem [thread:$0]  %s333_s0, 256, %s15_s10, [#allocation3], %s282_s19, %s282_s19, %s283_s20  }
  0x12   :  { %s284_s23 = smov [#allocation4]   ;;  %s255_s27 = scalar_lea.hbm %s334_s1, 640 }
  0x13   :  { %s26_s24 = sshll.u32 %s284_s23, 4  ;;  %p256_p8 = scmp.ne.s32.totalorder %s334_s1, %s255_s27  ;;  %s27_s24 = int_to_ptr.vmem [resolvable:$true] %s26_s24 }
  0x14   :  { %p259_p9 = scmp.lt.u32.totalorder %s255_s27, %s334_s1 }
  0x16   :  { %p261_p10 = pnand %p259_p9, %p256_p8 }
  0x18   :  { %264 = shalt.err (!%p261_p10)
}
  0x19   :  { %s265_s4 = scalar_lea.vmem %s27_s24, 640  ;;  %p270_p12 = scmp.lt.s32.totalorder %s27_s24, %s27_s24 }
  0x1a   :  { %p266_p11 = scmp.ne.s32.totalorder %s27_s24, %s265_s4  ;;  %p271_p13 = scmp.lt.s32.totalorder %s265_s4, %s265_s4 }
  0x1c   :  { %p272_p0 = por %p271_p13, %p270_p12 }
  0x1e   :  { %p273_p1 = pnand %p272_p0, %p266_p11 }
  0x20   :  { %276 = shalt.err (!%p273_p1)
}
  0x21   :  { %32 = dma.hbm_to_vmem [thread:$0]  %s334_s1, 640, %s27_s24, [#allocation5], %s282_s19, %s282_s19, %s283_s20  }
  0x22   :  { %277 = dma.done.wait [#allocation3], 256  }
  0x23   :  { %278 = vsyncadd [#allocation3], 4294967040 }
  0x24   :  { %279 = dma.done.wait [#allocation5], 640  }
  0x25   :  { %280 = vsyncadd [#allocation5], 4294966656  ;;  %vm46_vm0 = vcmask 261120   ;;  %v39_v0 = vld [vmem:[#allocation4] sm:$0xff]  ;;  %v40_v1 = vld [vmem:[#allocation4 + $0x8] sm:$0xff]  ;;  %vm149_vm1 = vcmask 1041409  }
  0x26   :  { %v41_v2 = vld [vmem:[#allocation4 + $0x10] sm:$0xff]  ;;  %v215_v3 = vpack.c.bf16 %v40_v1, %v39_v0  ;;  %v42_v4 = vld [vmem:[#allocation4 + $0x18] sm:$0xff]  ;;  %v197_v20 = vld [vmem:[#allocation4 + $0x20] ss:$0 sm:$0xff]  ;;  %vm152_vm2 = vcmask 1041408  }
  0x27   :  { %v44_v5 = vld [vmem:[#allocation2] sm:$0xff]  ;;  %v219_v6 = vpack.c.bf16 %v42_v4, %v41_v2  ;;  %v45_v7 = vld [vmem:[#allocation2 + $0x8] sm:$0xff] }
  0x28   :  { %212 = vmatprep.mubr.msk.f32.mxu0 %vm46_vm0, %v44_v5  ;;  %216 = vmatprep.subr.bf16.mxu0 %v215_v3 }
  0x29   :  { %218 = vmatpush3.bf16.msra.mxu0 %v215_v3 }
  0x2a   :  { %220 = vmatprep.subr.bf16.mxu0 %v219_v6 }
  0x2d   :  { %222 = vmatpush3.bf16.msra.mxu0 %v219_v6 }
  0x30   :  { %213 = vmatmul.mubr.msk.f32.vlgmr.msra.gmra.mrb[0].mxu0 %vm46_vm0, %v45_v7 }
 0x103   :  { %v214_v8 = vpop.f32.mrb[0].mxu0 }
 0x104   :  { %v134_v9 = vrot.slane %v214_v8, 4  ;;  %v119_v10 = vpop.f32.mrb[1].mxu0 }
 0x105   :  { %v128_v11 = vrot.slane %v119_v10, 4 }
 0x106   :  { %v135_v12 = vadd.f32 %v214_v8, %v134_v9 }
 0x107   :  { %v129_v13 = vadd.f32 %v128_v11, %v119_v10 }
 0x108   :  { %v136_v14 = vrot.slane %v135_v12, 2 }
 0x109   :  { %v130_v15 = vrot.slane %v129_v13, 2 }
 0x10a   :  { %v137_v16 = vadd.f32 %v136_v14, %v135_v12 }
 0x10b   :  { %v131_v17 = vadd.f32 %v130_v15, %v129_v13 }
 0x10c   :  { %v138_v18 = vrot.slane %v137_v16, 1 }
 0x10d   :  { %v132_v19 = vrot.slane %v131_v17, 1 }
 0x10e   :  { %v139_v21 = vadd.f32 %v138_v18, %v137_v16 }
 0x10f   :  { %v133_v22 = vadd.f32 %v132_v19, %v131_v17 }
 0x110   :  { %v145_v23 = vadd.f32 %v197_v20, %v139_v21 }
 0x111   :  { %v144_v24 = vadd.f32 %v197_v20, %v133_v22 }
 0x112   :  { %v148_v25 = vrot.slane %v145_v23, 7 }
 0x114   :  { %v150_v26 = vsel %vm149_vm1, %v148_v25, %v144_v24 }
 0x115   :  { %v153_v27 = vsel %vm152_vm2, %v150_v26, -inf }
 0x116   :  { %154 = vmax.xlane.f32.xlu0 %v153_v27 }
 0x1a3   :  { %v155_v28 = vpop.xlane.xlu0 %154 }
 0x1a4   :  { %v157_v29 = vrot.slane %v155_v28, 1  ;;  %v160_v30 = vsub.f32 %v144_v24, %v155_v28 }
 0x1a6   :  { %v161_v31 = vsub.f32 %v145_v23, %v157_v29  ;;  %v162_v32 = vmul.f32 1.442695, %v160_v30 }
 0x1a8   :  { %v164_v33 = vmul.f32 1.442695, %v161_v31 }
 0x1aa   :  { %227 = vpow2.f32 %v164_v33 }
 0x1ab   :  { %229 = vpow2.f32 %v162_v32 }
 0x1b4   :  { %v228_v34 = vpop.eup %227 }
 0x1b5   :  { %v168_v35 = vrot.slane %v228_v34, 7  ;;  %v230_v36 = vpop.eup %229 }
 0x1b7   :  { %v169_v37 = vsel %vm149_vm1, %v168_v35, %v230_v36 }
 0x1b8   :  { %v171_v38 = vsel %vm152_vm2, %v169_v37, 0.0 }
 0x1b9   :  { %172 = vadd.xlane.f32.xlu0 %v171_v38 }
 0x246   :  { %v173_v39 = vpop.xlane.xlu0 %172 }
 0x247   :  { %231 = vlog2.f32 %v173_v39 }
 0x251   :  { %v232_v40 = vpop.eup %231 }
 0x252   :  { %v175_v41 = vmul.f32 0.6931472, %v232_v40 }
 0x254   :  { %v177_v42 = vrot.slane %v175_v41, 1  ;;  %v180_v44 = vsub.f32 %v160_v30, %v175_v41 }
 0x256   :  { %v181_v43 = vsub.f32 %v161_v31, %v177_v42 }
 0x258   :  { %v184_v45 = vrot.slane %v181_v43, 7 }
 0x25a   :  { %v185_v46 = vsel %vm149_vm1, %v184_v45, %v180_v44 }
 0x25b   :  { %v187_v47 = vsel %vm152_vm2, %v185_v46, 0.0 }
 0x25c   :  { %188 = vst [vmem:[%s335_s2] sm:$0xff] %v187_v47 }
 0x25d   :  { %193 = vsyncpa [#allocation3], 1 }
 0x25e   :  { %194 = vsyncpa [#allocation5], 1 }

</bundles_post_ra>
